<compile_context>
chip_gen: v7x
topology: tpu7x:2x2x1
jax: 0.10.0
libtpu: 0.0.40
codegen_flags: <defaults>
</compile_context>

<pallas_src>
import math
import functools

import jax
import jax.numpy as jnp
from jax import lax
from jax.experimental import pallas as pl
from jax.experimental.pallas import tpu as pltpu


def _round_up(x, m):
    return ((x + m - 1) // m) * m


# --------------------------- fused QKV projection ----------------------------

def _qkv_proj_kernel(xq_ref, xk_ref, xv_ref, w_ref, b_ref, o_ref, *, d_model):
    D = d_model
    w = w_ref[...].astype(jnp.bfloat16)          # (D, 3D), resident across grid steps
    b = b_ref[...]                               # (1, 3D) f32
    for s, x_ref in enumerate((xq_ref, xk_ref, xv_ref)):
        y = lax.dot_general(
            x_ref[...].astype(jnp.bfloat16), w[:, s * D:(s + 1) * D],
            (((1,), (0,)), ((), ())), preferred_element_type=jnp.float32)
        y = y + b[:, s * D:(s + 1) * D]
        o_ref[:, s * D:(s + 1) * D] = y.astype(o_ref.dtype)


def qkv_projection(xq, xk, xv, w_qkv, b_qkv, *, tile_n=256):
    """[xq@wq | xk@wk | xv@wv] + b  in one pallas_call.  Output bf16 (N, 3*d_model)."""
    N, d_model = xq.shape
    d3 = w_qkv.shape[1]
    tn = min(tile_n, _round_up(N, 8))
    kernel = functools.partial(_qkv_proj_kernel, d_model=d_model)
    return pl.pallas_call(
        kernel,
        out_shape=jax.ShapeDtypeStruct((N, d3), jnp.bfloat16),
        grid=(pl.cdiv(N, tn),),
        in_specs=[
            pl.BlockSpec((tn, d_model), lambda i: (i, 0)),
            pl.BlockSpec((tn, d_model), lambda i: (i, 0)),
            pl.BlockSpec((tn, d_model), lambda i: (i, 0)),
            pl.BlockSpec((d_model, d3), lambda i: (0, 0)),   # weight pinned in VMEM
            pl.BlockSpec((1, d3), lambda i: (0, 0)),
        ],
        out_specs=pl.BlockSpec((tn, d3), lambda i: (i, 0)),
        compiler_params=pltpu.CompilerParams(dimension_semantics=("parallel",)),
    )(xq, xk, xv, w_qkv, b_qkv)


# ------------------------------ output projection -----------------------------

def _linear_kernel(x_ref, w_ref, b_ref, o_ref):
    y = lax.dot_general(
        x_ref[...].astype(jnp.bfloat16), w_ref[...].astype(jnp.bfloat16),
        (((1,), (0,)), ((), ())), preferred_element_type=jnp.float32)
    o_ref[...] = (y + b_ref[...]).astype(o_ref.dtype)


def linear(x, w, b, *, tile_n=256):
    """y = x @ w + b, row-tiled so the weight stays VMEM-resident and rows pipeline."""
    N, d_in = x.shape
    d_out = w.shape[1]
    tn = min(tile_n, _round_up(N, 8))
    return pl.pallas_call(
        _linear_kernel,
        out_shape=jax.ShapeDtypeStruct((N, d_out), jnp.float32),
        grid=(pl.cdiv(N, tn),),
        in_specs=[
            pl.BlockSpec((tn, d_in), lambda i: (i, 0)),
            pl.BlockSpec((d_in, d_out), lambda i: (0, 0)),
            pl.BlockSpec((1, d_out), lambda i: (0, 0)),
        ],
        out_specs=pl.BlockSpec((tn, d_out), lambda i: (i, 0)),
        compiler_params=pltpu.CompilerParams(dimension_semantics=("parallel",)),
    )(x, w, b)


# --------------------------------- attention ----------------------------------

def _attention_kernel(*refs, nheads, d_k, has_mask, return_probs):
    qkv_ref = refs[0]
    idx = 1
    mask_ref = None
    if has_mask:
        mask_ref = refs[idx]
        idx += 1
    o_ref = refs[idx]
    idx += 1
    p_ref = refs[idx] if return_probs else None

    D = nheads * d_k
    qkv = qkv_ref[0]                                      # (S, 3D) bf16

    for h in range(nheads):                               # all heads in one grid step
        q_h = qkv[:, h * d_k:(h + 1) * d_k]               # 1/sqrt(d_k) folded into wq
        k_h = qkv[:, D + h * d_k:D + (h + 1) * d_k]
        v_h = qkv[:, 2 * D + h * d_k:2 * D + (h + 1) * d_k]

        # q @ k^T without an explicit transpose: contract last dims of both.
        scores = lax.dot_general(
            q_h, k_h, (((1,), (1,)), ((), ())),
            preferred_element_type=jnp.float32)            # (S, S) f32

        if has_mask:
            msk = mask_ref[0, h] != 0
            scores = jnp.where(msk, -jnp.inf, scores)      # masked_fill(mask, -inf)

        m = jnp.max(scores, axis=-1, keepdims=True)
        e = jnp.exp(scores - m)
        if has_mask:
            e = jnp.where(msk, jnp.float32(0.0), e)        # kills NaN of fully-masked rows
        denom = jnp.sum(e, axis=-1, keepdims=True)
        # EUP reciprocal; per-row guard reproduces torch.nan_to_num(softmax, 0.0).
        inv = jnp.where(denom > 0.0, pl.reciprocal(denom, approx=True), jnp.float32(0.0))
        p = e * inv                                        # dropout = identity (eval mode)

        out_h = lax.dot_general(
            p.astype(jnp.bfloat16), v_h, (((1,), (0,)), ((), ())),
            preferred_element_type=jnp.float32)            # (S, d_k) f32

        o_ref[0, :, h * d_k:(h + 1) * d_k] = out_h.astype(o_ref.dtype)
        if return_probs:
            p_ref[0, h] = p


def attention(qkv, mask, *, nheads, d_k, return_probs):
    """qkv: (B, S, 3*d_model) bf16 -> out (B, S, d_model) f32 [, probs (B, H, S, S) f32]."""
    B, S, _ = qkv.shape
    d_model = nheads * d_k
    kernel = functools.partial(
        _attention_kernel, nheads=nheads, d_k=d_k,
        has_mask=mask is not None, return_probs=return_probs)

    in_specs = [pl.BlockSpec((1, S, 3 * d_model), lambda b: (b, 0, 0))]
    inputs = [qkv]
    if mask is not None:
        in_specs.append(pl.BlockSpec((1, nheads, S, S), lambda b: (b, 0, 0, 0)))
        inputs.append(mask)

    o_shape = jax.ShapeDtypeStruct((B, S, d_model), jnp.float32)
    o_spec = pl.BlockSpec((1, S, d_model), lambda b: (b, 0, 0))
    if return_probs:
        out_shape = (o_shape, jax.ShapeDtypeStruct((B, nheads, S, S), jnp.float32))
        out_specs = (o_spec, pl.BlockSpec((1, nheads, S, S), lambda b: (b, 0, 0, 0)))
    else:
        out_shape = o_shape
        out_specs = o_spec

    result = pl.pallas_call(
        kernel,
        out_shape=out_shape,
        grid=(B,),
        in_specs=in_specs,
        out_specs=out_specs,
        compiler_params=pltpu.CompilerParams(dimension_semantics=("parallel",)),
    )(*inputs)

    if return_probs:
        return result[0], result[1]
    return result, None


# ------------------------------ module wrapper --------------------------------

def init_params(key, d_model, nheads):
    assert d_model % nheads == 0
    d_k = d_model // nheads
    gain = 1.0 / math.sqrt(2.0)
    bound = gain * math.sqrt(6.0 / (d_model + d_model))   # xavier_uniform, gain=1/sqrt(2)
    kq, kk, kv, ko = jax.random.split(key, 4)

    def xavier(kkey):
        return jax.random.uniform(kkey, (d_model, d_model), jnp.float32, -bound, bound)

    wq, wk, wv, wo = xavier(kq), xavier(kk), xavier(kv), xavier(ko)
    scale = 1.0 / math.sqrt(d_k)
    # Fused (d_model, 3*d_model) QKV weight; 1/sqrt(d_k) folded into the Q section.
    w_qkv = jnp.concatenate([wq * scale, wk, wv], axis=1)
    return {
        "d_model": d_model,
        "nheads": nheads,
        "w_qkv": w_qkv.astype(jnp.bfloat16),                 # bf16 MXU inputs
        "b_qkv": jnp.zeros((1, 3 * d_model), jnp.float32),   # biases init to 0
        "w_o": wo.astype(jnp.bfloat16),
        "b_o": jnp.zeros((1, d_model), jnp.float32),
    }


def multihead_attention(params, q, k, v, mask=None, requires_attention=False):
    d_model = params["d_model"]
    nheads = params["nheads"]
    d_k = d_model // nheads
    B, Sq, _ = q.shape
    Sk = k.shape[1]
    if Sq != Sk:
        # TODO(synk): cross-attention with different q/kv lengths needs a split
        # (q, kv) attention kernel; only the equal-length path is wired here.
        raise NotImplementedError("q and k/v must have the same sequence length")

    qkv = qkv_projection(
        q.reshape(B * Sq, d_model),
        k.reshape(B * Sk, d_model),
        v.reshape(B * Sk, d_model),
        params["w_qkv"], params["b_qkv"],
    ).reshape(B, Sq, 3 * d_model)

    mask_i32 = None
    if mask is not None:
        mask_i32 = jnp.broadcast_to(mask, (B, nheads, Sq, Sk)).astype(jnp.int32)

    x, attn = attention(qkv, mask_i32, nheads=nheads, d_k=d_k,
                        return_probs=requires_attention)

    x = linear(x.reshape(B * Sq, d_model), params["w_o"], params["b_o"])
    x = x.reshape(B, Sq, d_model)

    if requires_attention:
        return x, attn
    return x, None


# ------------------------- pure-JAX reference (f32) ---------------------------

def reference_mha(params, q, k, v, mask=None):
    d_model = params["d_model"]
    H = params["nheads"]
    dk = d_model // H
    B, S, _ = q.shape
    w = params["w_qkv"].astype(jnp.float32)
    b = params["b_qkv"]
    qp = q @ w[:, :d_model] + b[:, :d_model]
    kp = k @ w[:, d_model:2 * d_model] + b[:, d_model:2 * d_model]
    vp = v @ w[:, 2 * d_model:] + b[:, 2 * d_model:]

    def split(x):
        return x.reshape(B, S, H, dk).transpose(0, 2, 1, 3)

    qh, kh, vh = split(qp), split(kp), split(vp)
    scores = jnp.einsum("bhqd,bhkd->bhqk", qh, kh)
    if mask is not None:
        scores = jnp.where(jnp.broadcast_to(mask, scores.shape), -jnp.inf, scores)
    p = jax.nn.softmax(scores, axis=-1)
    p = jnp.nan_to_num(p, nan=0.0)
    o = jnp.einsum("bhqk,bhkd->bhqd", p, vh)
    o = o.transpose(0, 2, 1, 3).reshape(B, S, d_model)
    out = o @ params["w_o"].astype(jnp.float32) + params["b_o"]
    return out, p


# ----------------------------------- demo --------------------------------------

if __name__ == "__main__":
    B, S, d_model, nheads = 2, 8, 32, 4

    key = jax.random.PRNGKey(0)
    kp, kq, kk, kv = jax.random.split(key, 4)
    params = init_params(kp, d_model, nheads)

    q = jax.random.normal(kq, (B, S, d_model), jnp.float32)
    k = jax.random.normal(kk, (B, S, d_model), jnp.float32)
    v = jax.random.normal(kv, (B, S, d_model), jnp.float32)

    # 1) unmasked, with attention probs
    out, attn = multihead_attention(params, q, k, v, mask=None, requires_attention=True)
    jax.block_until_ready(out)
    jax.block_until_ready(attn)
    assert out.shape == (B, S, d_model)
    assert attn.shape == (B, nheads, S, S)
    ref_out, ref_p = reference_mha(params, q, k, v, None)
    assert float(jnp.max(jnp.abs(out - ref_out))) < 0.1
    assert float(jnp.max(jnp.abs(attn - ref_p))) < 0.1

    # 2) unmasked, no attention probs (no S^2 writeback)
    out2, attn2 = multihead_attention(params, q, k, v)
    jax.block_until_ready(out2)
    assert attn2 is None
    assert float(jnp.max(jnp.abs(out2 - out))) < 1e-4

    # 3) causal boolean mask path
    causal = jnp.triu(jnp.ones((S, S), dtype=jnp.bool_), k=1)[None, None]  # True = masked
    out3, attn3 = multihead_attention(params, q, k, v, mask=causal, requires_attention=True)
    jax.block_until_ready(out3)
    ref_out3, ref_p3 = reference_mha(params, q, k, v, causal)
    assert float(jnp.max(jnp.abs(out3 - ref_out3))) < 0.1
    assert float(jnp.max(jnp.abs(attn3 - ref_p3))) < 0.1

    print("KERNEL_OK")
</pallas_src>

<mosaic_0001>
module attributes {stable_mosaic.version = 11 : i64} {
  func.func @_qkv_proj_kernel(%arg0: i32, %arg1: memref<16x32xf32, #tpu.memory_space<vmem>>, %arg2: memref<16x32xf32, #tpu.memory_space<vmem>>, %arg3: memref<16x32xf32, #tpu.memory_space<vmem>>, %arg4: memref<32x96xbf16, #tpu.memory_space<vmem>>, %arg5: memref<1x96xf32, #tpu.memory_space<vmem>>, %arg6: memref<16x96xbf16, #tpu.memory_space<vmem>>) attributes {dimension_semantics = [#tpu.dimension_semantics<parallel>], iteration_bounds = array<i64: 1>, scalar_prefetch = 0 : i64, scratch_operands = 0 : i64, tpu.core_type = #tpu.core_type<tc>, window_params = [{transform_indices = @transform_0, window_bounds = array<i64: 16, 32>}, {transform_indices = @transform_1, window_bounds = array<i64: 16, 32>}, {transform_indices = @transform_2, window_bounds = array<i64: 16, 32>}, {pipeline_mode = #tpu.pipeline_mode<synchronous>, transform_indices = @transform_3, window_bounds = array<i64: 32, 96>}, {pipeline_mode = #tpu.pipeline_mode<synchronous>, transform_indices = @transform_4, window_bounds = array<i64: 1, 96>}, {transform_indices = @transform_5, window_bounds = array<i64: 16, 96>}]} {
    %c0 = arith.constant 0 : index
    %c0_0 = arith.constant 0 : index
    %0 = vector.load %arg4[%c0, %c0_0] : memref<32x96xbf16, #tpu.memory_space<vmem>>, vector<32x96xbf16>
    %c0_1 = arith.constant 0 : index
    %c0_2 = arith.constant 0 : index
    %1 = vector.load %arg5[%c0_1, %c0_2] : memref<1x96xf32, #tpu.memory_space<vmem>>, vector<1x96xf32>
    %c0_3 = arith.constant 0 : index
    %c0_4 = arith.constant 0 : index
    %2 = vector.load %arg1[%c0_3, %c0_4] : memref<16x32xf32, #tpu.memory_space<vmem>>, vector<16x32xf32>
    %3 = arith.truncf %2 : vector<16x32xf32> to vector<16x32xbf16>
    %4 = vector.extract_strided_slice %0 {offsets = [0, 0], sizes = [32, 32], strides = [1, 1]} : vector<32x96xbf16> to vector<32x32xbf16>
    %cst = arith.constant dense<0.000000e+00> : vector<16x32xf32>
    %5 = tpu.matmul %3, %4, %cst {dimension_numbers = #tpu.dot_dimension_numbers<[1], [0], [0], [1], [0, 0, 1, 1], [], []>} : vector<16x32xbf16>, vector<32x32xbf16>, vector<16x32xf32> -> vector<16x32xf32>
    %6 = vector.extract_strided_slice %1 {offsets = [0, 0], sizes = [1, 32], strides = [1, 1]} : vector<1x96xf32> to vector<1x32xf32>
    %7 = vector.broadcast %6 : vector<1x32xf32> to vector<16x32xf32>
    %8 = arith.addf %5, %7 : vector<16x32xf32>
    %9 = arith.truncf %8 : vector<16x32xf32> to vector<16x32xbf16>
    %c0_5 = arith.constant 0 : index
    %c0_6 = arith.constant 0 : index
    %10 = vector.load %arg6[%c0_5, %c0_6] : memref<16x96xbf16, #tpu.memory_space<vmem>>, vector<16x32xbf16>
    tpu.vector_store %arg6[%c0_5, %c0_6], %9 {strides = array<i32>} : memref<16x96xbf16, #tpu.memory_space<vmem>>, vector<16x32xbf16>,
    %c0_7 = arith.constant 0 : index
    %c0_8 = arith.constant 0 : index
    %11 = vector.load %arg2[%c0_7, %c0_8] : memref<16x32xf32, #tpu.memory_space<vmem>>, vector<16x32xf32>
    %12 = arith.truncf %11 : vector<16x32xf32> to vector<16x32xbf16>
    %13 = vector.extract_strided_slice %0 {offsets = [0, 32], sizes = [32, 32], strides = [1, 1]} : vector<32x96xbf16> to vector<32x32xbf16>
    %cst_9 = arith.constant dense<0.000000e+00> : vector<16x32xf32>
    %14 = tpu.matmul %12, %13, %cst_9 {dimension_numbers = #tpu.dot_dimension_numbers<[1], [0], [0], [1], [0, 0, 1, 1], [], []>} : vector<16x32xbf16>, vector<32x32xbf16>, vector<16x32xf32> -> vector<16x32xf32>
    %15 = vector.extract_strided_slice %1 {offsets = [0, 32], sizes = [1, 32], strides = [1, 1]} : vector<1x96xf32> to vector<1x32xf32>
    %16 = vector.broadcast %15 : vector<1x32xf32> to vector<16x32xf32>
    %17 = arith.addf %14, %16 : vector<16x32xf32>
    %18 = arith.truncf %17 : vector<16x32xf32> to vector<16x32xbf16>
    %c0_10 = arith.constant 0 : index
    %c32 = arith.constant 32 : index
    %19 = vector.load %arg6[%c0_10, %c32] : memref<16x96xbf16, #tpu.memory_space<vmem>>, vector<16x32xbf16>
    tpu.vector_store %arg6[%c0_10, %c32], %18 {strides = array<i32>} : memref<16x96xbf16, #tpu.memory_space<vmem>>, vector<16x32xbf16>,
    %c0_11 = arith.constant 0 : index
    %c0_12 = arith.constant 0 : index
    %20 = vector.load %arg3[%c0_11, %c0_12] : memref<16x32xf32, #tpu.memory_space<vmem>>, vector<16x32xf32>
    %21 = arith.truncf %20 : vector<16x32xf32> to vector<16x32xbf16>
    %22 = vector.extract_strided_slice %0 {offsets = [0, 64], sizes = [32, 32], strides = [1, 1]} : vector<32x96xbf16> to vector<32x32xbf16>
    %cst_13 = arith.constant dense<0.000000e+00> : vector<16x32xf32>
    %23 = tpu.matmul %21, %22, %cst_13 {dimension_numbers = #tpu.dot_dimension_numbers<[1], [0], [0], [1], [0, 0, 1, 1], [], []>} : vector<16x32xbf16>, vector<32x32xbf16>, vector<16x32xf32> -> vector<16x32xf32>
    %24 = vector.extract_strided_slice %1 {offsets = [0, 64], sizes = [1, 32], strides = [1, 1]} : vector<1x96xf32> to vector<1x32xf32>
    %25 = vector.broadcast %24 : vector<1x32xf32> to vector<16x32xf32>
    %26 = arith.addf %23, %25 : vector<16x32xf32>
    %27 = arith.truncf %26 : vector<16x32xf32> to vector<16x32xbf16>
    %c0_14 = arith.constant 0 : index
    %c64 = arith.constant 64 : index
    %28 = vector.load %arg6[%c0_14, %c64] : memref<16x96xbf16, #tpu.memory_space<vmem>>, vector<16x32xbf16>
    tpu.vector_store %arg6[%c0_14, %c64], %27 {strides = array<i32>} : memref<16x96xbf16, #tpu.memory_space<vmem>>, vector<16x32xbf16>,
    return
  }
  func.func @transform_0(%arg0: i32) -> (i32, i32) {
    %c0_i32 = arith.constant 0 : i32
    %c0_i32_0 = arith.constant 0 : i32
    return %arg0, %c0_i32 : i32, i32
  }
  func.func @transform_1(%arg0: i32) -> (i32, i32) {
    %c0_i32 = arith.constant 0 : i32
    %c0_i32_0 = arith.constant 0 : i32
    return %arg0, %c0_i32 : i32, i32
  }
  func.func @transform_2(%arg0: i32) -> (i32, i32) {
    %c0_i32 = arith.constant 0 : i32
    %c0_i32_0 = arith.constant 0 : i32
    return %arg0, %c0_i32 : i32, i32
  }
  func.func @transform_3(%arg0: i32) -> (i32, i32) {
    %c0_i32 = arith.constant 0 : i32
    %c0_i32_0 = arith.constant 0 : i32
    %c0_i32_1 = arith.constant 0 : i32
    return %c0_i32, %c0_i32_0 : i32, i32
  }
  func.func @transform_4(%arg0: i32) -> (i32, i32) {
    %c0_i32 = arith.constant 0 : i32
    %c0_i32_0 = arith.constant 0 : i32
    %c0_i32_1 = arith.constant 0 : i32
    return %c0_i32, %c0_i32_0 : i32, i32
  }
  func.func @transform_5(%arg0: i32) -> (i32, i32) {
    %c0_i32 = arith.constant 0 : i32
    %c0_i32_0 = arith.constant 0 : i32
    return %arg0, %c0_i32 : i32, i32
  }
}

</mosaic_0001>

<bundles_post_ra>
// kernel: tpu_custom_call.1
= control target key start
LH: loop header
LB: loop body
LE: loop exit
PB: predicated region body
PF: predicated region fallthrough
CT: control target
= control target key end

     0   :  { %10 = vsyncpa [#allocation3], 0  ;;  %s650_s0 = inlined_call_operand.hbm [shape: f32[16,32], index: 0, kind: input, shape index: {}]   ;;  %s651_s1 = inlined_call_operand.hbm [shape: f32[16,32], index: 1, kind: input, shape index: {}]   ;;  %s652_s2 = inlined_call_operand.hbm [shape: f32[16,32], index: 2, kind: input, shape index: {}]   ;;  %s653_s3 = inlined_call_operand.hbm [shape: bf16[32,96], index: 3, kind: input, shape index: {}]   ;;  %s654_s4 = inlined_call_operand.vmem [shape: f32[1,96], index: 4, kind: input, shape index: {}]   ;;  %s655_s5 = inlined_call_operand.hbm [shape: bf16[16,96], index: 5, kind: output, shape index: {}]  }
   0x1   :  { %11 = vsyncpa [#allocation6], 0 }
   0x2   :  { %12 = vsyncpa [#allocation9], 0 }
   0x3   :  { %13 = vsyncpa [#allocation4], 0  ;;  %s504_s18 = smov [#allocation5]   ;;  %s505_s20 = smov [#allocation2]  }
   0x4   :  { %s31_s19 = sshll.u32 %s504_s18, 4  ;;  %s19_s21 = sshll.u32 %s505_s20, 4  ;;  %s32_s19 = int_to_ptr.vmem [resolvable:$true] %s31_s19  ;;  %s547_s21 = int_to_ptr.vmem [resolvable:$true] %s19_s21 }
   0x5   :  { %s386_s24 = scalar_lea.hbm %s651_s1, 256 }
   0x6   :  { %p387_p0 = scmp.ne.s32.totalorder %s651_s1, %s386_s24  ;;  %p390_p1 = scmp.lt.u32.totalorder %s386_s24, %s651_s1 }
   0x8   :  { %p392_p2 = pnand %p390_p1, %p387_p0 }
   0xa   :  { %395 = shalt.err (!%p392_p2)
}
   0xb   :  { %s396_s29 = scalar_lea.vmem %s32_s19, 256  ;;  %p401_p4 = scmp.lt.s32.totalorder %s32_s19, %s32_s19 }
   0xc   :  { %p397_p3 = scmp.ne.s32.totalorder %s32_s19, %s396_s29  ;;  %p402_p5 = scmp.lt.s32.totalorder %s396_s29, %s396_s29 }
   0xe   :  { %p403_p6 = por %p402_p5, %p401_p4 }
  0x10   :  { %p404_p7 = pnand %p403_p6, %p397_p3 }
  0x12   :  { %407 = shalt.err (!%p404_p7)
}
  0x13   :  { %s506_s30 = smov 128   ;;  %s507_s6 = smov 8  }
  0x14   :  { %37 = dma.hbm_to_vmem [thread:$0]  %s651_s1, 256, %s32_s19, [#allocation6], %s506_s30, %s506_s30, %s507_s6  }
  0x15   :  { %s408_s11 = scalar_lea.hbm %s650_s0, 256 }
  0x16   :  { %p409_p8 = scmp.ne.s32.totalorder %s650_s0, %s408_s11  ;;  %p412_p9 = scmp.lt.u32.totalorder %s408_s11, %s650_s0 }
  0x18   :  { %p414_p10 = pnand %p412_p9, %p409_p8 }
  0x1a   :  { %417 = shalt.err (!%p414_p10)
}
  0x1b   :  { %s418_s16 = scalar_lea.vmem %s547_s21, 256  ;;  %p423_p12 = scmp.lt.s32.totalorder %s547_s21, %s547_s21 }
  0x1c   :  { %p419_p11 = scmp.ne.s32.totalorder %s547_s21, %s418_s16  ;;  %p424_p13 = scmp.lt.s32.totalorder %s418_s16, %s418_s16 }
  0x1e   :  { %p425_p0 = por %p424_p13, %p423_p12 }
  0x20   :  { %p426_p1 = pnand %p425_p0, %p419_p11 }
  0x22   :  { %429 = shalt.err (!%p426_p1)
}
  0x23   :  { %25 = dma.hbm_to_vmem [thread:$0]  %s650_s0, 256, %s547_s21, [#allocation3], %s506_s30, %s506_s30, %s507_s6  }
  0x24   :  { %s508_s18 = smov [#allocation7]   ;;  %s509_s20 = smov [#allocation8]  }
  0x25   :  { %s43_s19 = sshll.u32 %s508_s18, 4  ;;  %s55_s22 = sshll.u32 %s509_s20, 4  ;;  %s44_s19 = int_to_ptr.vmem [resolvable:$true] %s43_s19  ;;  %s584_s22 = int_to_ptr.vmem [resolvable:$true] %s55_s22 }
  0x26   :  { %s430_s25 = scalar_lea.hbm %s652_s2, 256 }
  0x27   :  { %p431_p2 = scmp.ne.s32.totalorder %s652_s2, %s430_s25  ;;  %p434_p3 = scmp.lt.u32.totalorder %s430_s25, %s652_s2 }
  0x29   :  { %p436_p4 = pnand %p434_p3, %p431_p2 }
  0x2b   :  { %439 = shalt.err (!%p436_p4)
}
  0x2c   :  { %s440_s0 = scalar_lea.vmem %s44_s19, 256  ;;  %p445_p6 = scmp.lt.s32.totalorder %s44_s19, %s44_s19 }
  0x2d   :  { %p441_p5 = scmp.ne.s32.totalorder %s44_s19, %s440_s0  ;;  %p446_p7 = scmp.lt.s32.totalorder %s440_s0, %s440_s0 }
  0x2f   :  { %p447_p8 = por %p446_p7, %p445_p6 }
  0x31   :  { %p448_p9 = pnand %p447_p8, %p441_p5 }
  0x33   :  { %451 = shalt.err (!%p448_p9)
}
  0x34   :  { %49 = dma.hbm_to_vmem [thread:$0]  %s652_s2, 256, %s44_s19, [#allocation6], %s506_s30, %s506_s30, %s507_s6  }
  0x35   :  { %s452_s10 = scalar_lea.hbm %s653_s3, 256 }
  0x36   :  { %p453_p10 = scmp.ne.s32.totalorder %s653_s3, %s452_s10  ;;  %p456_p11 = scmp.lt.u32.totalorder %s452_s10, %s653_s3 }
  0x38   :  { %p458_p12 = pnand %p456_p11, %p453_p10 }
  0x3a   :  { %461 = shalt.err (!%p458_p12)
}
  0x3b   :  { %s462_s15 = scalar_lea.vmem %s584_s22, 256  ;;  %p467_p0 = scmp.lt.s32.totalorder %s584_s22, %s584_s22 }
  0x3c   :  { %p463_p13 = scmp.ne.s32.totalorder %s584_s22, %s462_s15  ;;  %p468_p1 = scmp.lt.s32.totalorder %s462_s15, %s462_s15 }
  0x3e   :  { %p469_p2 = por %p468_p1, %p467_p0 }
  0x40   :  { %p470_p3 = pnand %p469_p2, %p463_p13 }
  0x42   :  { %473 = shalt.err (!%p470_p3)
}
  0x43   :  { %s510_s2 = smov 64   ;;  %s511_s30 = smov 4  }
  0x44   :  { %61 = dma.hbm_to_vmem [thread:$0]  %s653_s3, 256, %s584_s22, [#allocation9], %s510_s2, %s510_s2, %s511_s30  }
  0x45   :  { %496 = dma.done.wait [#allocation3], 256  }
  0x46   :  { %497 = vsyncadd [#allocation3], 4294967040 }
  0x47   :  { %498 = dma.done.wait [#allocation6], 512  }
  0x48   :  { %499 = vsyncadd [#allocation6], 4294966784 }
  0x49   :  { %500 = dma.done.wait [#allocation9], 256  }
  0x4a   :  { %501 = vsyncadd [#allocation9], 4294967040  ;;  %v512_v0 = vmov 0.0   ;;  %vm513_vm0 = vmmov 0   ;;  %v384_v1 = vld [vmem:[#allocation8] sm:$0xff]   ;;  %v385_v2 = vld [vmem:[#allocation8 + $0x8] sm:$0xff]  }
  0x4b   :  { %347 = vmatprep.subr.bf16.mxu0 %v512_v0  ;;  %355 = vmatprep.subr.bf16.mxu1 %v512_v0  ;;  %s514_s1 = smov 96   ;;  %v82_v3 = vld [vmem:[#allocation2] sm:$0xff]  ;;  %v83_v4 = vld [vmem:[#allocation2 + $0x8] sm:$0xff]  ;;  %vm103_vm1 = vcmask 261120   ;;  %v159_v9 = vld [vmem:[#allocation5] sm:$0xff]  ;;  %vm156_vm2 = vcmask 257024  }
  0x4c   :  { %351 = vmatprep.mubr.msk.bf16.mxu0 %vm513_vm0, %v512_v0  ;;  %359 = vmatprep.mubr.msk.bf16.mxu1 %vm513_vm0, %v512_v0  ;;  %v84_v5 = vpack.c.bf16 %v83_v4, %v82_v3  ;;  %v320_v6 = vld [vmem:[%s654_s4] ss:$0 sm:$0xff]  ;;  %v160_v10 = vld [vmem:[#allocation5 + $0x8] sm:$0xff]  ;;  %v231_v14 = vld [vmem:[#allocation7 + $0x8] sm:$0xff]  ;;  %s515_s4 = smov 32   ;;  %vm227_vm3 = vcmask 519424  }
  0x4d   :  { %162 = vrot.lane.b32.xlu0 %v384_v1, %s514_s1  ;;  %348 = vmatpush3.bf16.msra.mxu0 %v384_v1  ;;  %v161_v12 = vpack.c.bf16 %v160_v10, %v159_v9  ;;  %v230_v13 = vld [vmem:[#allocation7] sm:$0xff]  ;;  %vm298_vm4 = vcmask 781824   ;;  %s516_s18 = smov [#allocation10]  }
  0x4e   :  { %164 = vrot.lane.b32.xlu1 %v385_v2, %s514_s1  ;;  %349 = vmatprep.subr.bf16.mxu0 %v512_v0  ;;  %v232_v16 = vpack.c.bf16 %v231_v14, %v230_v13  ;;  %s306_s19 = sshll.u32 %s516_s18, 4  ;;  %s307_s19 = int_to_ptr.vmem [resolvable:$true] %s306_s19 }
  0x4f   :  { %s474_s20 = scalar_lea.vmem %s307_s19, 128  ;;  %p479_p5 = scmp.lt.s32.totalorder %s307_s19, %s307_s19 }
  0x50   :  { %p475_p4 = scmp.ne.s32.totalorder %s307_s19, %s474_s20  ;;  %p480_p6 = scmp.lt.s32.totalorder %s474_s20, %s474_s20 }
  0x51   :  { %233 = vrot.lane.b32.xlu0 %v384_v1, %s510_s2  ;;  %350 = vmatpush3.bf16.msra.mxu0 %v385_v2 }
  0x52   :  { %235 = vrot.lane.b32.xlu1 %v385_v2, %s510_s2  ;;  %363 = vmatprep.subr.bf16.mxu0 %v512_v0  ;;  %p481_p7 = por %p480_p6, %p479_p5 }
  0x54   :  { %352 = vmatmul.mubr.msk.bf16.vlgmr.msra.gmra.mrb[0].mxu0 %vm103_vm1, %v84_v5  ;;  %p482_p8 = pnand %p481_p7, %p475_p4 }
  0x55   :  { %367 = vmatprep.mubr.msk.bf16.mxu0 %vm513_vm0, %v512_v0  ;;  %168 = vrot.lane.b32.xlu0 %v320_v6, %s514_s1 }
  0x56   :  { %239 = vrot.lane.b32.xlu1 %v320_v6, %s510_s2 }
  0xbf   :  { %v163_v7 = vpop.permute.xlu0 %162 }
  0xc0   :  { %356 = vmatpush3.bf16.msra.mxu1 %v163_v7  ;;  %v165_v8 = vpop.permute.xlu1 %164 }
  0xc1   :  { %357 = vmatprep.subr.bf16.mxu1 %v512_v0 }
  0xc3   :  { %v234_v11 = vpop.permute.xlu0 %233 }
  0xc4   :  { %358 = vmatpush3.bf16.msra.mxu1 %v165_v8  ;;  %364 = vmatpush3.bf16.msra.mxu0 %v234_v11  ;;  %v236_v15 = vpop.permute.xlu1 %235 }
  0xc5   :  { %365 = vmatprep.subr.bf16.mxu0 %v512_v0 }
  0xc7   :  { %360 = vmatmul.mubr.msk.bf16.vlgmr.msra.gmra.mrb[0].mxu1 %vm103_vm1, %v161_v12  ;;  %v169_v25 = vpop.permute.xlu0 %168 }
  0xc8   :  { %366 = vmatpush3.bf16.msra.mxu0 %v236_v15  ;;  %v240_v30 = vpop.permute.xlu1 %239 }
  0xcb   :  { %368 = vmatmul.mubr.msk.bf16.vlgmr.msra.gmra.mrb[4].mxu0 %vm103_vm1, %v232_v16 }
 0x127   :  { %v141_v17 = vpop.f32.mrb[0].mxu0 }
 0x128   :  { %v142_v18 = vadd.f32 %v320_v6, %v141_v17  ;;  %v353_v19 = vpop.f32.mrb[1].mxu0 }
 0x129   :  { %v144_v20 = vpop.f32.mrb[2].mxu0 }
 0x12a   :  { %v332_v21 = vpack.c.bf16 %v142_v18, %v142_v18  ;;  %v145_v22 = vadd.f32 %v320_v6, %v144_v20  ;;  %v354_v23 = vpop.f32.mrb[3].mxu0 }
 0x12c   :  { %157 = vst.msk [vmem:[#allocation10] sm:$0xf] %vm156_vm2, %v332_v21  ;;  %v333_v24 = vpack.c.bf16 %v145_v22, %v145_v22 }
 0x12e   :  { %158 = vst.msk [vmem:[#allocation10 + $0x4] sm:$0xf] %vm156_vm2, %v333_v24 }
 0x19a   :  { %v208_v26 = vpop.f32.mrb[0].mxu1 }
 0x19b   :  { %v361_v27 = vpop.f32.mrb[1].mxu1  ;;  %v209_v28 = vadd.f32 %v208_v26, %v169_v25 }
 0x19c   :  { %v211_v29 = vpop.f32.mrb[2].mxu1 }
 0x19d   :  { %v334_v31 = vpack.c.bf16 %v209_v28, %v209_v28  ;;  %v212_v32 = vadd.f32 %v211_v29, %v169_v25  ;;  %v362_v33 = vpop.f32.mrb[3].mxu1 }
 0x19e   :  { %v279_v34 = vpop.f32.mrb[4].mxu0 }
 0x19f   :  { %v335_v35 = vpack.c.bf16 %v212_v32, %v212_v32  ;;  %v280_v36 = vadd.f32 %v279_v34, %v240_v30  ;;  %v369_v37 = vpop.f32.mrb[5].mxu0  ;;  %221 = vrot.lane.b32.xlu0 %v334_v31, %s515_s4 }
 0x1a0   :  { %v282_v38 = vpop.f32.mrb[6].mxu0 }
 0x1a1   :  { %v283_v39 = vadd.f32 %v282_v38, %v240_v30  ;;  %223 = vrot.lane.b32.xlu1 %v335_v35, %s515_s4  ;;  %v370_v40 = vpop.f32.mrb[7].mxu0  ;;  %v336_v41 = vpack.c.bf16 %v280_v36, %v280_v36 }
 0x1a3   :  { %v337_v42 = vpack.c.bf16 %v283_v39, %v283_v39  ;;  %292 = vrot.lane.b32.xlu0 %v336_v41, %s510_s2 }
 0x1a5   :  { %294 = vrot.lane.b32.xlu1 %v337_v42, %s510_s2 }
 0x211   :  { %v222_v43 = vpop.permute.xlu0 %221 }
 0x212   :  { %228 = vst.msk [vmem:[#allocation10] sm:$0xf] %vm227_vm3, %v222_v43 }
 0x213   :  { %v224_v44 = vpop.permute.xlu1 %223 }
 0x214   :  { %229 = vst.msk [vmem:[#allocation10 + $0x4] sm:$0xf] %vm227_vm3, %v224_v44 }
 0x215   :  { %v293_v45 = vpop.permute.xlu0 %292 }
 0x216   :  { %299 = vst.msk [vmem:[#allocation10] sm:$0xf] %vm298_vm4, %v293_v45 }
 0x217   :  { %v295_v46 = vpop.permute.xlu1 %294 }
 0x218   :  { %300 = vst.msk [vmem:[#allocation10 + $0x4] sm:$0xf] %vm298_vm4, %v295_v46 }
 0x219   :  { %485 = shalt.err (!%p482_p8)
}
 0x21a   :  { %s486_s24 = scalar_lea.hbm %s655_s5, 128 }
 0x21b   :  { %p487_p9 = scmp.ne.s32.totalorder %s655_s5, %s486_s24  ;;  %p490_p10 = scmp.lt.u32.totalorder %s486_s24, %s655_s5 }
 0x21d   :  { %p492_p11 = pnand %p490_p10, %p487_p9 }
 0x21f   :  { %495 = shalt.err (!%p492_p11)
}
 0x220   :  { %312 = dma.vmem_to_hbm [thread:$0]  %s307_s19, 128, %s655_s5, [#allocation4], %s510_s2, %s510_s2, %s511_s30  }
 0x221   :  { %502 = dma.done.wait [#allocation4], 128  }
 0x222   :  { %503 = vsyncadd [#allocation4], 4294967168 }
 0x223   :  { %316 = vsyncpa [#allocation3], 1 }
 0x224   :  { %317 = vsyncpa [#allocation6], 1 }
 0x225   :  { %318 = vsyncpa [#allocation9], 1 }
 0x226   :  { %319 = vsyncpa [#allocation4], 1 }

</bundles_post_ra>
